<compile_context>
chip_gen: v6e
topology: v6e:2x2x1
jax: 0.10.0
libtpu: 0.0.40
codegen_flags: <defaults>
</compile_context>

<pallas_src>
import functools
import math

import jax
import jax.numpy as jnp
from jax.experimental import pallas as pl
from jax.experimental.pallas import tpu as pltpu

NEG_INF = -1e30
VMEM_LIMIT_BYTES = 64 * 1024 * 1024


# --------------------------- pltpu.roll direction probe ----------------------------

@functools.lru_cache(maxsize=None)
def _roll_is_jnp_convention() -> bool:
    """One-time probe of pltpu.roll's shift direction (call outside jit first).

    Returns True iff pltpu.roll(x, s, axis)[..., i] == x[..., (i - s) % n]
    (the jnp.roll convention).  The RoPE half-swap is direction-sensitive, so
    we pin the convention against the running toolchain instead of assuming.
    """
    def _probe(x_ref, o_ref):
        o_ref[...] = pltpu.roll(x_ref[...], 1, 1)

    x = jnp.tile(jax.lax.iota(jnp.int32, 128)[None, :], (8, 1))
    y = pl.pallas_call(_probe,
                       out_shape=jax.ShapeDtypeStruct((8, 128), jnp.int32))(x)
    return int(y[0, 1]) == 0


# ----------------------- Fused QKV projection (+ rotary) kernel --------------------

def _qkv_rope_kernel(x_ref, w_ref, b_ref, cs_ref, q_ref, k_ref, v_ref, *, roll_is_jnp):
    # x_ref: (tm, d_in) f32   w_ref: (d_in, d_q + 2*d_kv) bf16   b_ref: (1, n_out) f32
    # cs_ref: (tm, 2) f32 [cos | sin]
    # q_ref: (tm, d_q) bf16   k_ref / v_ref: (n_kv, tm, dh) bf16 (kv-head-major)
    d_q = q_ref.shape[1]
    n_kv, _, dh = k_ref.shape
    d_kv = n_kv * dh
    d_qk = d_q + d_kv
    dh2 = dh // 2

    # One wide MXU matmul produces q|k|v for this token tile (f32 accumulation).
    y = jnp.dot(x_ref[...].astype(jnp.bfloat16), w_ref[...],
                preferred_element_type=jnp.float32) + b_ref[...]

    c = cs_ref[:, 0:1]                                    # (tm, 1)
    s = cs_ref[:, 1:2]

    # RoPE on the q|k slab.  Wq/Wk columns were permuted per head in the wrapper
    # to [even rotary features | odd rotary features] ("deinterleaved"; q_h.k_h
    # is invariant under a permutation shared by q and its kv head), so:
    #   out_even = ye*c - yo*s ,   out_odd = yo*c + ye*s
    # The within-head half-swap (ye <-> yo) is two full-width XLU rolls + one
    # select + a +/-1 lane pattern — no per-head slices, no concatenate.
    y_qk = y[:, :d_qk]
    col = jax.lax.broadcasted_iota(jnp.int32, (1, d_qk), 1)
    even_half = (col // dh2) % 2 == 0                     # (1, d_qk) bool
    fwd, bwd = dh2, d_qk - dh2                            # dest gets src[i-dh2] / src[i+dh2] (jnp conv)
    even_shift, odd_shift = (bwd, fwd) if roll_is_jnp else (fwd, bwd)
    swapped = jnp.where(even_half,
                        pltpu.roll(y_qk, even_shift, 1),
                        pltpu.roll(y_qk, odd_shift, 1))
    sgn = jnp.where(even_half, jnp.float32(-1.0), jnp.float32(1.0))
    rot = y_qk * c + swapped * (s * sgn)

    q_ref[...] = rot[:, :d_q].astype(q_ref.dtype)
    # K/V emitted directly in kv-head-major layout so the flash kernel needs no
    # XLA-side transpose (n_kv is small: dim / (group * head_dim)).
    for h in range(n_kv):
        k_ref[h] = rot[:, d_q + h * dh:d_q + (h + 1) * dh].astype(k_ref.dtype)
        v_ref[h] = y[:, d_qk + h * dh:d_qk + (h + 1) * dh].astype(v_ref.dtype)


def qkv_rope_pallas(x, w_cat, b_cat, cs, *, d_q, d_kv, head_dim, n_kv_heads, tm=256):
    b, s_len, d_in = x.shape
    n_out = w_cat.shape[1]
    dh = head_dim
    assert n_out == d_q + 2 * d_kv
    assert d_kv == n_kv_heads * dh
    tm = min(tm, s_len)
    assert s_len % tm == 0, "seq_len must be divisible by the projection tile"

    kernel = functools.partial(_qkv_rope_kernel,
                               roll_is_jnp=_roll_is_jnp_convention())
    return pl.pallas_call(
        kernel,
        out_shape=(jax.ShapeDtypeStruct((b, s_len, d_q), jnp.bfloat16),
                   jax.ShapeDtypeStruct((b, n_kv_heads, s_len, dh), jnp.bfloat16),
                   jax.ShapeDtypeStruct((b, n_kv_heads, s_len, dh), jnp.bfloat16)),
        grid_spec=pltpu.PrefetchScalarGridSpec(
            num_scalar_prefetch=0,
            grid=(b, s_len // tm),
            in_specs=[
                pl.BlockSpec((None, tm, d_in), lambda bi, si: (bi, si, 0)),
                # Weight/bias block index never changes -> fetched once by the
                # pipeline.  TODO(synk): at dim >= ~2048 single-buffer these
                # (pipeline_mode=pl.Buffered(1)) and tile N / add a K-reduction
                # grid axis (mandatory on v7x's 64 MiB VMEM); tiny at dims here.
                pl.BlockSpec((d_in, n_out), lambda bi, si: (0, 0)),
                pl.BlockSpec((1, n_out), lambda bi, si: (0, 0)),
                pl.BlockSpec((tm, 2), lambda bi, si: (si, 0)),
            ],
            out_specs=[
                pl.BlockSpec((None, tm, d_q), lambda bi, si: (bi, si, 0)),
                pl.BlockSpec((None, n_kv_heads, tm, dh), lambda bi, si: (bi, 0, si, 0)),
                pl.BlockSpec((None, n_kv_heads, tm, dh), lambda bi, si: (bi, 0, si, 0)),
            ],
        ),
        compiler_params=pltpu.CompilerParams(
            dimension_semantics=("parallel", "parallel"),
            vmem_limit_bytes=VMEM_LIMIT_BYTES),
    )(x, w_cat, b_cat.reshape(1, n_out), cs)


# ----------------------------- Output projection kernel ----------------------------

def _linear_kernel(x_ref, w_ref, b_ref, o_ref):
    y = jnp.dot(x_ref[...].astype(jnp.bfloat16), w_ref[...],
                preferred_element_type=jnp.float32)
    o_ref[...] = (y + b_ref[...]).astype(o_ref.dtype)


def linear_pallas(x2d, w, b, *, tm=256, out_dtype=jnp.float32):
    m, k = x2d.shape
    n = w.shape[1]
    tm = min(tm, m)
    assert m % tm == 0
    return pl.pallas_call(
        _linear_kernel,
        out_shape=jax.ShapeDtypeStruct((m, n), out_dtype),
        grid_spec=pltpu.PrefetchScalarGridSpec(
            num_scalar_prefetch=0,
            grid=(m // tm,),
            in_specs=[
                pl.BlockSpec((tm, k), lambda i: (i, 0)),
                # Resident weight/bias; see the single-buffer / N-tiling TODO above.
                pl.BlockSpec((k, n), lambda i: (0, 0)),
                pl.BlockSpec((1, n), lambda i: (0, 0)),
            ],
            out_specs=pl.BlockSpec((tm, n), lambda i: (i, 0)),
        ),
        compiler_params=pltpu.CompilerParams(
            dimension_semantics=("parallel",),
            vmem_limit_bytes=VMEM_LIMIT_BYTES),
    )(x2d, w, b.reshape(1, n))


# ----------------------------- Flash attention kernel ------------------------------

def _flash_attn_kernel(q_ref, k_ref, v_ref, o_ref, m_sc, l_sc, acc_sc):
    # q_ref: (tq, group*dh) bf16 — all query heads of this kv-head (lane dense).
    # k_ref, v_ref: (tk, dh) bf16.   o_ref: (tq, group*dh) bf16.
    # Softmax scale is already folded into Wq (wrapper), so K is used as-is.
    tq = q_ref.shape[0]
    tk, dh = k_ref.shape
    group = q_ref.shape[1] // dh

    qi = pl.program_id(2)
    ki = pl.program_id(3)

    @pl.when(ki == 0)
    def _init():
        m_sc[...] = jnp.full_like(m_sc, NEG_INF)
        l_sc[...] = jnp.zeros_like(l_sc)
        acc_sc[...] = jnp.zeros_like(acc_sc)

    q_first = qi * tq
    q_last = qi * tq + tq - 1
    k_first = ki * tk
    k_last = ki * tk + tk - 1

    def _process(apply_mask):
        k_t = k_ref[...]
        v_t = v_ref[...]
        if apply_mask:
            row = q_first + jax.lax.broadcasted_iota(jnp.int32, (tq, tk), 0)
            col = k_first + jax.lax.broadcasted_iota(jnp.int32, (tq, tk), 1)
            keep = row >= col
        # Per-head online softmax; each result is written straight into a static
        # slice of the scratch refs (no lists / jnp.concatenate) so the live set
        # per k-step is one head's (tq, tk)/(tq, dh) tiles.
        for h in range(group):
            qh = q_ref[:, h * dh:(h + 1) * dh]
            s = jax.lax.dot_general(qh, k_t, (((1,), (1,)), ((), ())),
                                    preferred_element_type=jnp.float32)
            if apply_mask:
                s = jnp.where(keep, s, NEG_INF)
            m_prev = m_sc[:, h:h + 1]
            m_new = jnp.maximum(m_prev, jnp.max(s, axis=-1, keepdims=True))
            alpha = jnp.exp(m_prev - m_new)
            p = jnp.exp(s - m_new)
            l_sc[:, h:h + 1] = alpha * l_sc[:, h:h + 1] + jnp.sum(p, axis=-1,
                                                                  keepdims=True)
            pv = jax.lax.dot_general(p.astype(jnp.bfloat16), v_t,
                                     (((1,), (0,)), ((), ())),
                                     preferred_element_type=jnp.float32)
            acc_sc[:, h * dh:(h + 1) * dh] = (
                alpha * acc_sc[:, h * dh:(h + 1) * dh] + pv)
            m_sc[:, h:h + 1] = m_new

    # Diagonal-straddling blocks: compute with the causal mask.
    @pl.when(jnp.logical_and(q_last >= k_first, q_first < k_last))
    def _masked():
        _process(True)

    # Fully-visible blocks (strictly at/below the diagonal): no mask work.
    @pl.when(q_first >= k_last)
    def _unmasked():
        _process(False)

    # Fully-masked blocks (q_last < k_first) do no compute; their K/V block
    # index is clamped in the index_map so the DMA is elided too.

    @pl.when(ki == pl.num_programs(3) - 1)
    def _finalize():
        inv_l = pl.reciprocal(l_sc[...], approx=True)      # (tq, group)
        for h in range(group):
            o_ref[:, h * dh:(h + 1) * dh] = (
                acc_sc[:, h * dh:(h + 1) * dh] * inv_l[:, h:h + 1]
            ).astype(o_ref.dtype)


def flash_attention_pallas(q, k, v, *, group, head_dim, tq=256, tk=256):
    # q: (B, S, H*dh) bf16 (flat, head-major: per-kv-group slabs are contiguous)
    # k, v: (B, KVH, S, dh) bf16
    b, s, d = q.shape
    kvh = k.shape[1]
    dh = head_dim
    assert d == kvh * group * dh
    tq = min(tq, s)
    tk = min(tk, s)
    assert s % tq == 0 and s % tk == 0
    assert (group * dh) % 128 == 0, "q/o slab must be lane-dense (group*head_dim % 128 == 0)"

    # Fully-masked (skipped) steps clamp the K/V block index to the last useful
    # one, so the pipeline elides their DMA entirely.
    def kv_index(bi, gi, qi, ki):
        return (bi, gi, jnp.minimum(ki, (qi * tq + tq - 1) // tk), 0)

    return pl.pallas_call(
        _flash_attn_kernel,
        out_shape=jax.ShapeDtypeStruct((b, s, d), jnp.bfloat16),
        grid_spec=pltpu.PrefetchScalarGridSpec(
            num_scalar_prefetch=0,
            grid=(b, kvh, s // tq, s // tk),
            in_specs=[
                pl.BlockSpec((None, tq, group * dh),
                             lambda bi, gi, qi, ki: (bi, qi, gi)),
                pl.BlockSpec((None, None, tk, dh), kv_index),
                pl.BlockSpec((None, None, tk, dh), kv_index),
            ],
            out_specs=pl.BlockSpec((None, tq, group * dh),
                                   lambda bi, gi, qi, ki: (bi, qi, gi)),
            scratch_shapes=[
                pltpu.VMEM((tq, group), jnp.float32),        # running max
                pltpu.VMEM((tq, group), jnp.float32),        # running sum
                pltpu.VMEM((tq, group * dh), jnp.float32),   # output accumulator
            ],
        ),
        compiler_params=pltpu.CompilerParams(
            dimension_semantics=("parallel", "parallel", "parallel", "arbitrary"),
            vmem_limit_bytes=VMEM_LIMIT_BYTES),
    )(q, k, v)


# ------------------------------- Module forward -------------------------------------

def flash_attention_forward(x, cos, sin, params, *, n_heads, n_kv_heads,
                            tq=256, tk=256, tm=256):
    B, S, D = x.shape
    dh = D // n_heads
    group = n_heads // n_kv_heads
    kvd = n_kv_heads * dh
    scale = 1.0 / math.sqrt(dh)

    # --- one-time weight preprocessing (wrapper-side, out of the hot path) ---
    # 1) Per-head "deinterleave" of Wq/Wk columns (+ biases): even rotary
    #    features first, then odd ones, within each head.  q_h.k_h is invariant
    #    under this shared permutation; it makes in-kernel RoPE a few wide ops.
    # 2) The 1/sqrt(head_dim) softmax scale is folded into Wq/bq (RoPE is
    #    linear), so the flash kernel never rescales K.
    def deinterleave_cols(w, n_h):
        d_in = w.shape[0]
        return (w.reshape(d_in, n_h, dh // 2, 2)
                 .transpose(0, 1, 3, 2)
                 .reshape(d_in, n_h * dh))

    def deinterleave_bias(bb, n_h):
        return bb.reshape(n_h, dh // 2, 2).transpose(0, 2, 1).reshape(n_h * dh)

    wq_d = deinterleave_cols(params["wq"] * scale, n_heads)
    bq_d = deinterleave_bias(params["bq"] * scale, n_heads)
    wk_d = deinterleave_cols(params["wk"], n_kv_heads)
    bk_d = deinterleave_bias(params["bk"], n_kv_heads)

    w_cat = jnp.concatenate([wq_d, wk_d, params["wv"]], axis=1).astype(jnp.bfloat16)
    b_cat = jnp.concatenate([bq_d, bk_d, params["bv"]], axis=0).astype(jnp.float32)

    # cos/sin packed into one (S, 2) slab -> one small DMA per tile.
    cs = jnp.concatenate([cos.reshape(S, 1), sin.reshape(S, 1)],
                         axis=1).astype(jnp.float32)

    # Fused q/k/v projection + RoPE: x streamed from HBM exactly once; q comes
    # out in its flat (B, S, D) layout (no transpose needed for attention), k/v
    # directly in kv-head-major (B, KVH, S, dh) (no XLA transpose between kernels).
    q, k, v = qkv_rope_pallas(x, w_cat, b_cat, cs, d_q=D, d_kv=kvd,
                              head_dim=dh, n_kv_heads=n_kv_heads, tm=tm)

    # TODO(synk): flash_attn_func dropout_p=0.1 omitted (stochastic; eval semantics).
    o = flash_attention_pallas(q, k, v, group=group, head_dim=dh, tq=tq, tk=tk)

    # Output projection.  Kept f32 to match the nn.Module output dtype; pass
    # out_dtype=jnp.bfloat16 if the consumer tolerates it (halves HBM writeback).
    out = linear_pallas(o.reshape(B * S, D),
                        params["wo"].astype(jnp.bfloat16), params["bo"], tm=tm)
    return out.reshape(B, S, D)


# ------------------------------- Pure-JAX reference ---------------------------------

def _ref_forward(x, cos, sin, params, n_heads, n_kv_heads, head_dim):
    B, S, D = x.shape
    group = n_heads // n_kv_heads

    def rope(t):
        te, to = t[..., ::2], t[..., 1::2]
        re = te * cos - to * sin
        ro = to * cos + te * sin
        out = jnp.zeros_like(t)
        out = out.at[..., ::2].set(re)
        out = out.at[..., 1::2].set(ro)
        return out

    q = x @ params["wq"] + params["bq"]
    k = x @ params["wk"] + params["bk"]
    v = x @ params["wv"] + params["bv"]
    q, k = rope(q), rope(k)
    q = q.reshape(B, S, n_heads, head_dim)
    k = jnp.repeat(k.reshape(B, S, n_kv_heads, head_dim), group, axis=2)
    v = jnp.repeat(v.reshape(B, S, n_kv_heads, head_dim), group, axis=2)
    s = jnp.einsum("bqhd,bkhd->bhqk", q, k) / math.sqrt(head_dim)
    mask = jnp.tril(jnp.ones((S, S), dtype=bool))
    s = jnp.where(mask[None, None], s, -jnp.inf)
    a = jax.nn.softmax(s, axis=-1)
    o = jnp.einsum("bhqk,bkhd->bqhd", a, v).reshape(B, S, D)
    return o @ params["wo"] + params["bo"]


# ----------------------------------------- main -------------------------------------

if __name__ == "__main__":
    # GovnArgs-style config scaled down: dim=256, n_heads=4, group_query_size=2
    # -> n_kv_heads=2, head_dim=64 (same head_dim as the default 1024/16 config).
    B, S = 2, 512
    DIM, H, GROUP = 256, 4, 2
    KVH = H // GROUP
    DH = DIM // H

    key = jax.random.PRNGKey(0)
    kx, kq, kk, kv, ko = jax.random.split(key, 5)

    def init_linear(k_, fan_in, fan_out):
        bound = 1.0 / math.sqrt(fan_in)
        kw, kb = jax.random.split(k_)
        w = jax.random.uniform(kw, (fan_in, fan_out), jnp.float32, -bound, bound)
        b = jax.random.uniform(kb, (fan_out,), jnp.float32, -bound, bound)
        return w, b

    wq, bq = init_linear(kq, DIM, H * DH)
    wk, bk = init_linear(kk, DIM, KVH * DH)
    wv, bv = init_linear(kv, DIM, KVH * DH)
    wo, bo = init_linear(ko, DIM, DIM)
    params = dict(wq=wq, bq=bq, wk=wk, bk=bk, wv=wv, bv=bv, wo=wo, bo=bo)

    x = jax.random.normal(kx, (B, S, DIM), jnp.float32)
    # cos/sin broadcast against the flat q (dim) and flat k (kv_dim) -> (S, 1)
    angle = jnp.arange(S, dtype=jnp.float32)[:, None] * 0.05
    cos, sin = jnp.cos(angle), jnp.sin(angle)

    # S=512 with tq=tk=256 exercises all three causal-block paths
    # (fully-masked/skipped, diagonal/masked, fully-visible/unmasked) while
    # using MXU-filling 256-wide tiles.
    out = flash_attention_forward(x, cos, sin, params, n_heads=H, n_kv_heads=KVH,
                                  tq=256, tk=256, tm=256)
    out = jax.block_until_ready(out)
    assert out.shape == (B, S, DIM)

    with jax.default_matmul_precision("highest"):
        ref = _ref_forward(x, cos, sin, params, H, KVH, DH)
    max_err = float(jnp.max(jnp.abs(out - ref)))
    assert jnp.allclose(out, ref, atol=3e-2, rtol=3e-2), f"max abs err = {max_err}"

    print("KERNEL_OK")
</pallas_src>

<mosaic_0001>
module attributes {stable_mosaic.version = 11 : i64} {
  func.func @_probe(%arg0: memref<8x128xi32, #tpu.memory_space<vmem>>, %arg1: memref<8x128xi32, #tpu.memory_space<vmem>>) attributes {dimension_semantics = [], scalar_prefetch = 0 : i64, scratch_operands = 0 : i64, tpu.core_type = #tpu.core_type<tc>} {
    %c0 = arith.constant 0 : index
    %c0_0 = arith.constant 0 : index
    %0 = vector.load %arg0[%c0, %c0_0] : memref<8x128xi32, #tpu.memory_space<vmem>>, vector<8x128xi32>
    %c1_i32 = arith.constant 1 : i32
    %1 = tpu.dynamic_rotate %0 by %c1_i32 dim 1 : vector<8x128xi32>, i32 -> vector<8x128xi32>
    %c0_1 = arith.constant 0 : index
    %c0_2 = arith.constant 0 : index
    %2 = vector.load %arg1[%c0_1, %c0_2] : memref<8x128xi32, #tpu.memory_space<vmem>>, vector<8x128xi32>
    tpu.vector_store %arg1[%c0_1, %c0_2], %1 {strides = array<i32>} : memref<8x128xi32, #tpu.memory_space<vmem>>, vector<8x128xi32>,
    return
  }
}

</mosaic_0001>

<bundles_post_ra>
// kernel: tpu_custom_call.1
= control target key start
LH: loop header
LB: loop body
LE: loop exit
PB: predicated region body
PF: predicated region fallthrough
CT: control target
= control target key end

     0   :  { %6 = vsyncpa [#allocation3], 0  ;;  %s106_s0 = inlined_call_operand.hbm [shape: s32[8,128], index: 0, kind: input, shape index: {}]   ;;  %s107_s1 = inlined_call_operand.hbm [shape: s32[8,128], index: 1, kind: output, shape index: {}]  }
   0x1   :  { %7 = vsyncpa [#allocation4], 0  ;;  %s87_s6 = smov [#allocation2]  }
   0x2   :  { %s14_s7 = sshll.u32 %s87_s6, 4  ;;  %s15_s7 = int_to_ptr.vmem [resolvable:$true] %s14_s7 }
   0x3   :  { %s51_s8 = scalar_lea.vmem %s15_s7, 128  ;;  %p56_p1 = scmp.lt.s32.totalorder %s15_s7, %s15_s7 }
   0x4   :  { %p52_p0 = scmp.ne.s32.totalorder %s15_s7, %s51_s8  ;;  %p57_p2 = scmp.lt.s32.totalorder %s51_s8, %s51_s8 }
   0x6   :  { %p58_p3 = por %p57_p2, %p56_p1 }
   0x8   :  { %p59_p4 = pnand %p58_p3, %p52_p0 }
   0xa   :  { %62 = shalt.err (!%p59_p4)
}
   0xb   :  { %17 = dma.hbm_to_vmem [thread:$0]  %s106_s0, 128, %s15_s7, [#allocation3]  }
   0xc   :  { %83 = dma.done.wait [#allocation3], 128  }
   0xd   :  { %84 = vsyncadd [#allocation3], 4294967168  ;;  %v21_v0 = vld [vmem:[#allocation2] sm:$0xff]  ;;  %s88_s11 = smov 1   ;;  %s89_s12 = smov [#allocation5]  }
   0xe   :  { %22 = vrot.lane.b32.xlu0 %v21_v0, %s88_s11  ;;  %s31_s13 = sshll.u32 %s89_s12, 4  ;;  %s32_s13 = int_to_ptr.vmem [resolvable:$true] %s31_s13 }
   0xf   :  { %s63_s14 = scalar_lea.vmem %s32_s13, 128  ;;  %p68_p6 = scmp.lt.s32.totalorder %s32_s13, %s32_s13 }
  0x10   :  { %p64_p5 = scmp.ne.s32.totalorder %s32_s13, %s63_s14  ;;  %p69_p7 = scmp.lt.s32.totalorder %s63_s14, %s63_s14 }
  0x12   :  { %p70_p8 = por %p69_p7, %p68_p6 }
  0x14   :  { %p71_p9 = pnand %p70_p8, %p64_p5 }
  0x80   :  { %v23_v1 = vpop.permute.xlu0 %22 }
  0x81   :  { %24 = vst [vmem:[#allocation5] sm:$0xff] %v23_v1 }
  0x82   :  { %74 = shalt.err (!%p71_p9)
}
  0x83   :  { %34 = dma.vmem_to_hbm [thread:$0]  %s32_s13, 128, %s107_s1, [#allocation4]  }
  0x84   :  { %85 = dma.done.wait [#allocation4], 128  }
  0x85   :  { %86 = vsyncadd [#allocation4], 4294967168 }
  0x86   :  { %38 = vsyncpa [#allocation3], 1 }
  0x87   :  { %39 = vsyncpa [#allocation4], 1 }

</bundles_post_ra>
